<compile_context>
chip_gen: v6e
topology: v6e:2x2x1
jax: 0.10.0
libtpu: 0.0.40
codegen_flags: <defaults>
</compile_context>

<pallas_src>
import jax
import jax.numpy as jnp
from jax.experimental import pallas as pl
from jax.experimental.pallas import tpu as pltpu


def _round_up(x: int, m: int) -> int:
    return ((x + m - 1) // m) * m


def _mlp_policy_kernel(obs_ref, w1_ref, b1_ref, w2_ref, b2_ref, w3_ref, b3_ref,
                       mean_ref):
    """One batch tile of mean_net: [Linear -> tanh] * 2 -> Linear (f32 accumulation)."""
    compute_dtype = w1_ref.dtype

    # hidden layer 1: Linear + tanh (bias add / tanh in f32)
    h = jnp.dot(obs_ref[...], w1_ref[...], preferred_element_type=jnp.float32)
    h = jnp.tanh(h + b1_ref[...])

    # hidden layer 2: Linear + tanh
    h = jnp.dot(h.astype(compute_dtype), w2_ref[...],
                preferred_element_type=jnp.float32)
    h = jnp.tanh(h + b2_ref[...])

    # output layer: Linear (identity activation)
    mean = jnp.dot(h.astype(compute_dtype), w3_ref[...],
                   preferred_element_type=jnp.float32) + b3_ref[...]
    mean_ref[...] = mean.astype(mean_ref.dtype)


def mlp_policy_forward(obs, params, *, compute_dtype=jnp.float32, batch_tile=512):
    """MLPPolicy.forward() hot path as a batch-tiled Pallas TPU kernel.

    Args:
      obs:    [B, ob_dim] float32 observations.
      params: dict with w1 [ob_dim,size], b1 [1,size], w2 [size,size], b2 [1,size],
              w3 [size,ac_dim], b3 [1,ac_dim], logstd [1,ac_dim].
      compute_dtype: matmul input dtype (jnp.float32, or jnp.bfloat16 for the
              bf16-native MXU on v6e/v7x); accumulation is always f32.
      batch_tile: max batch rows per grid step (pipelined / double-buffered).

    Returns:
      (mean, std): each [B, ac_dim] float32 — the Normal distribution parameters.
    """
    B, ob_dim = obs.shape
    size = params["w1"].shape[1]
    ac_dim = params["w3"].shape[1]

    # Batch tile: multiple of 16 rows (covers f32 (8,·) and bf16 (16,·) sublane tiling),
    # capped so big batches are streamed instead of blowing the scoped VMEM limit.
    TB = min(batch_tile, _round_up(B, 16))
    B_pad = _round_up(B, TB)

    obs_c = obs.astype(compute_dtype)
    if B_pad != B:
        obs_c = jnp.pad(obs_c, ((0, B_pad - B), (0, 0)))

    w1 = params["w1"].astype(compute_dtype)
    w2 = params["w2"].astype(compute_dtype)
    w3 = params["w3"].astype(compute_dtype)
    b1 = params["b1"].astype(jnp.float32)
    b2 = params["b2"].astype(jnp.float32)
    b3 = params["b3"].astype(jnp.float32)

    # Weights / biases: whole-array block with constant index_map -> DMA'd once,
    # resident in VMEM across every batch tile.
    def resident(shape):
        return pl.BlockSpec(shape, lambda i: (0, 0))

    grid = (B_pad // TB,)
    mean_padded = pl.pallas_call(
        _mlp_policy_kernel,
        out_shape=jax.ShapeDtypeStruct((B_pad, ac_dim), jnp.float32),
        grid=grid,
        in_specs=[
            pl.BlockSpec((TB, ob_dim), lambda i: (i, 0)),  # obs: streamed per batch tile
            resident((ob_dim, size)), resident((1, size)),
            resident((size, size)),   resident((1, size)),
            resident((size, ac_dim)), resident((1, ac_dim)),
        ],
        out_specs=pl.BlockSpec((TB, ac_dim), lambda i: (i, 0)),
        compiler_params=pltpu.CompilerParams(
            # v7x: both TensorCores take half the batch tiles; no-op on v5e/v6e.
            dimension_semantics=("parallel",),
            vmem_limit_bytes=32 * 1024 * 1024,
        ),
    )(obs_c, w1, b1, w2, b2, w3, b3)

    mean = mean_padded[:B]
    # Normal(mean, exp(logstd)): std is constant per action dim, so it is computed once
    # here instead of being written as a redundant [B, ac_dim] kernel output.
    std = jnp.broadcast_to(jnp.exp(params["logstd"].astype(jnp.float32)), mean.shape)
    return mean, std


def init_params(key, ob_dim, ac_dim, n_layers, size):
    """Deterministic init mirroring nn.Linear default (uniform +/- 1/sqrt(fan_in))."""
    assert n_layers == 2, "this synthetic kernel is specialized to n_layers=2"
    ks = jax.random.split(key, 6)

    def lin(kw, kb, fan_in, fan_out):
        bound = 1.0 / jnp.sqrt(fan_in)
        w = jax.random.uniform(kw, (fan_in, fan_out), jnp.float32, -bound, bound)
        b = jax.random.uniform(kb, (1, fan_out), jnp.float32, -bound, bound)
        return w, b

    w1, b1 = lin(ks[0], ks[1], ob_dim, size)
    w2, b2 = lin(ks[2], ks[3], size, size)
    w3, b3 = lin(ks[4], ks[5], size, ac_dim)
    logstd = jnp.zeros((1, ac_dim), jnp.float32)  # nn.Parameter(torch.zeros(ac_dim))
    return dict(w1=w1, b1=b1, w2=w2, b2=b2, w3=w3, b3=b3, logstd=logstd)


def _reference_forward(obs, p):
    h = jnp.tanh(obs @ p["w1"] + p["b1"])
    h = jnp.tanh(h @ p["w2"] + p["b2"])
    mean = h @ p["w3"] + p["b3"]
    std = jnp.broadcast_to(jnp.exp(p["logstd"]), mean.shape)
    return mean, std


if __name__ == "__main__":
    # Small shapes consistent with the module: batch=8, ob_dim=16, ac_dim=8,
    # n_layers=2, size=32 (continuous policy branch).
    B, OB_DIM, AC_DIM, N_LAYERS, SIZE = 8, 16, 8, 2, 32

    key = jax.random.PRNGKey(0)
    k_obs, k_params = jax.random.split(key)

    obs = jax.random.normal(k_obs, (B, OB_DIM), jnp.float32)
    params = init_params(k_params, OB_DIM, AC_DIM, N_LAYERS, SIZE)

    # f32 path: bit-for-bit comparable to the pure-JAX reference.
    mean, std = mlp_policy_forward(obs, params, compute_dtype=jnp.float32)
    jax.block_until_ready((mean, std))

    ref_mean, ref_std = _reference_forward(obs, params)
    assert mean.shape == (B, AC_DIM) and std.shape == (B, AC_DIM)
    assert jnp.allclose(mean, ref_mean, atol=1e-5, rtol=1e-5)
    assert jnp.allclose(std, ref_std, atol=1e-6, rtol=1e-6)

    # bf16 matmul path (MXU-native on v6e/v7x); f32 accumulation keeps it close.
    mean_bf16, _ = mlp_policy_forward(obs, params, compute_dtype=jnp.bfloat16)
    jax.block_until_ready(mean_bf16)
    assert jnp.allclose(mean_bf16, ref_mean, atol=5e-2, rtol=5e-2)

    # TODO(synk): the discrete branch (Categorical over logits) and Normal.sample() in
    # get_action() are distribution-object / host-side concerns, not part of the
    # forward() hot path; the kernel returns the (mean, std) parameters instead.
    print("KERNEL_OK")
</pallas_src>

<mosaic_0001>
module attributes {stable_mosaic.version = 11 : i64} {
  func.func @_mlp_policy_kernel(%arg0: i32, %arg1: memref<16x16xf32, #tpu.memory_space<vmem>>, %arg2: memref<16x32xf32, #tpu.memory_space<vmem>>, %arg3: memref<1x32xf32, #tpu.memory_space<vmem>>, %arg4: memref<32x32xf32, #tpu.memory_space<vmem>>, %arg5: memref<1x32xf32, #tpu.memory_space<vmem>>, %arg6: memref<32x8xf32, #tpu.memory_space<vmem>>, %arg7: memref<1x8xf32, #tpu.memory_space<vmem>>, %arg8: memref<16x8xf32, #tpu.memory_space<vmem>>) attributes {dimension_semantics = [#tpu.dimension_semantics<parallel>], iteration_bounds = array<i64: 1>, scalar_prefetch = 0 : i64, scratch_operands = 0 : i64, tpu.core_type = #tpu.core_type<tc>, window_params = [{transform_indices = @transform_0, window_bounds = array<i64: 16, 16>}, {pipeline_mode = #tpu.pipeline_mode<synchronous>, transform_indices = @transform_1, window_bounds = array<i64: 16, 32>}, {pipeline_mode = #tpu.pipeline_mode<synchronous>, transform_indices = @transform_2, window_bounds = array<i64: 1, 32>}, {pipeline_mode = #tpu.pipeline_mode<synchronous>, transform_indices = @transform_3, window_bounds = array<i64: 32, 32>}, {pipeline_mode = #tpu.pipeline_mode<synchronous>, transform_indices = @transform_4, window_bounds = array<i64: 1, 32>}, {pipeline_mode = #tpu.pipeline_mode<synchronous>, transform_indices = @transform_5, window_bounds = array<i64: 32, 8>}, {pipeline_mode = #tpu.pipeline_mode<synchronous>, transform_indices = @transform_6, window_bounds = array<i64: 1, 8>}, {transform_indices = @transform_7, window_bounds = array<i64: 16, 8>}]} {
    %c0 = arith.constant 0 : index
    %c0_0 = arith.constant 0 : index
    %0 = vector.load %arg1[%c0, %c0_0] : memref<16x16xf32, #tpu.memory_space<vmem>>, vector<16x16xf32>
    %c0_1 = arith.constant 0 : index
    %c0_2 = arith.constant 0 : index
    %1 = vector.load %arg2[%c0_1, %c0_2] : memref<16x32xf32, #tpu.memory_space<vmem>>, vector<16x32xf32>
    %cst = arith.constant dense<0.000000e+00> : vector<16x32xf32>
    %2 = tpu.matmul %0, %1, %cst {dimension_numbers = #tpu.dot_dimension_numbers<[1], [0], [0], [1], [0, 0, 1, 1], [], []>} : vector<16x16xf32>, vector<16x32xf32>, vector<16x32xf32> -> vector<16x32xf32>
    %c0_3 = arith.constant 0 : index
    %c0_4 = arith.constant 0 : index
    %3 = vector.load %arg3[%c0_3, %c0_4] : memref<1x32xf32, #tpu.memory_space<vmem>>, vector<1x32xf32>
    %4 = vector.broadcast %3 : vector<1x32xf32> to vector<16x32xf32>
    %5 = arith.addf %2, %4 : vector<16x32xf32>
    %6 = math.tanh %5 : vector<16x32xf32>
    %c0_5 = arith.constant 0 : index
    %c0_6 = arith.constant 0 : index
    %7 = vector.load %arg4[%c0_5, %c0_6] : memref<32x32xf32, #tpu.memory_space<vmem>>, vector<32x32xf32>
    %cst_7 = arith.constant dense<0.000000e+00> : vector<16x32xf32>
    %8 = tpu.matmul %6, %7, %cst_7 {dimension_numbers = #tpu.dot_dimension_numbers<[1], [0], [0], [1], [0, 0, 1, 1], [], []>} : vector<16x32xf32>, vector<32x32xf32>, vector<16x32xf32> -> vector<16x32xf32>
    %c0_8 = arith.constant 0 : index
    %c0_9 = arith.constant 0 : index
    %9 = vector.load %arg5[%c0_8, %c0_9] : memref<1x32xf32, #tpu.memory_space<vmem>>, vector<1x32xf32>
    %10 = vector.broadcast %9 : vector<1x32xf32> to vector<16x32xf32>
    %11 = arith.addf %8, %10 : vector<16x32xf32>
    %12 = math.tanh %11 : vector<16x32xf32>
    %c0_10 = arith.constant 0 : index
    %c0_11 = arith.constant 0 : index
    %13 = vector.load %arg6[%c0_10, %c0_11] : memref<32x8xf32, #tpu.memory_space<vmem>>, vector<32x8xf32>
    %cst_12 = arith.constant dense<0.000000e+00> : vector<16x8xf32>
    %14 = tpu.matmul %12, %13, %cst_12 {dimension_numbers = #tpu.dot_dimension_numbers<[1], [0], [0], [1], [0, 0, 1, 1], [], []>} : vector<16x32xf32>, vector<32x8xf32>, vector<16x8xf32> -> vector<16x8xf32>
    %c0_13 = arith.constant 0 : index
    %c0_14 = arith.constant 0 : index
    %15 = vector.load %arg7[%c0_13, %c0_14] : memref<1x8xf32, #tpu.memory_space<vmem>>, vector<1x8xf32>
    %16 = vector.broadcast %15 : vector<1x8xf32> to vector<16x8xf32>
    %17 = arith.addf %14, %16 : vector<16x8xf32>
    %c0_15 = arith.constant 0 : index
    %c0_16 = arith.constant 0 : index
    %18 = vector.load %arg8[%c0_15, %c0_16] : memref<16x8xf32, #tpu.memory_space<vmem>>, vector<16x8xf32>
    tpu.vector_store %arg8[%c0_15, %c0_16], %17 {strides = array<i32>} : memref<16x8xf32, #tpu.memory_space<vmem>>, vector<16x8xf32>,
    return
  }
  func.func @transform_0(%arg0: i32) -> (i32, i32) {
    %c0_i32 = arith.constant 0 : i32
    %c0_i32_0 = arith.constant 0 : i32
    return %arg0, %c0_i32 : i32, i32
  }
  func.func @transform_1(%arg0: i32) -> (i32, i32) {
    %c0_i32 = arith.constant 0 : i32
    %c0_i32_0 = arith.constant 0 : i32
    %c0_i32_1 = arith.constant 0 : i32
    return %c0_i32, %c0_i32_0 : i32, i32
  }
  func.func @transform_2(%arg0: i32) -> (i32, i32) {
    %c0_i32 = arith.constant 0 : i32
    %c0_i32_0 = arith.constant 0 : i32
    %c0_i32_1 = arith.constant 0 : i32
    return %c0_i32, %c0_i32_0 : i32, i32
  }
  func.func @transform_3(%arg0: i32) -> (i32, i32) {
    %c0_i32 = arith.constant 0 : i32
    %c0_i32_0 = arith.constant 0 : i32
    %c0_i32_1 = arith.constant 0 : i32
    return %c0_i32, %c0_i32_0 : i32, i32
  }
  func.func @transform_4(%arg0: i32) -> (i32, i32) {
    %c0_i32 = arith.constant 0 : i32
    %c0_i32_0 = arith.constant 0 : i32
    %c0_i32_1 = arith.constant 0 : i32
    return %c0_i32, %c0_i32_0 : i32, i32
  }
  func.func @transform_5(%arg0: i32) -> (i32, i32) {
    %c0_i32 = arith.constant 0 : i32
    %c0_i32_0 = arith.constant 0 : i32
    %c0_i32_1 = arith.constant 0 : i32
    return %c0_i32, %c0_i32_0 : i32, i32
  }
  func.func @transform_6(%arg0: i32) -> (i32, i32) {
    %c0_i32 = arith.constant 0 : i32
    %c0_i32_0 = arith.constant 0 : i32
    %c0_i32_1 = arith.constant 0 : i32
    return %c0_i32, %c0_i32_0 : i32, i32
  }
  func.func @transform_7(%arg0: i32) -> (i32, i32) {
    %c0_i32 = arith.constant 0 : i32
    %c0_i32_0 = arith.constant 0 : i32
    return %arg0, %c0_i32 : i32, i32
  }
}

</mosaic_0001>

<bundles_post_ra>
// kernel: tpu_custom_call.1
= control target key start
LH: loop header
LB: loop body
LE: loop exit
PB: predicated region body
PF: predicated region fallthrough
CT: control target
= control target key end

     0   :  { %12 = vsyncpa [#allocation3], 0  ;;  %s548_s0 = inlined_call_operand.hbm [shape: f32[16,16], index: 0, kind: input, shape index: {}]   ;;  %s549_s1 = inlined_call_operand.hbm [shape: f32[16,32], index: 1, kind: input, shape index: {}]   ;;  %s550_s2 = inlined_call_operand.vmem [shape: f32[1,32], index: 2, kind: input, shape index: {}]   ;;  %s551_s3 = inlined_call_operand.vmem [shape: f32[32,32], index: 3, kind: input, shape index: {}]   ;;  %s552_s4 = inlined_call_operand.vmem [shape: f32[1,32], index: 4, kind: input, shape index: {}]   ;;  %s553_s5 = inlined_call_operand.vmem [shape: f32[32,8], index: 5, kind: input, shape index: {}]   ;;  %s554_s6 = inlined_call_operand.vmem [shape: f32[1,8], index: 6, kind: input, shape index: {}]   ;;  %s555_s7 = inlined_call_operand.vmem [shape: f32[16,8], index: 7, kind: output, shape index: {}]  }
   0x1   :  { %13 = vsyncpa [#allocation5], 0  ;;  %s455_s24 = smov [#allocation2]  }
   0x2   :  { %s19_s25 = sshll.u32 %s455_s24, 4  ;;  %s20_s25 = int_to_ptr.vmem [resolvable:$true] %s19_s25 }
   0x3   :  { %s419_s26 = scalar_lea.vmem %s20_s25, 256  ;;  %p424_p1 = scmp.lt.s32.totalorder %s20_s25, %s20_s25 }
   0x4   :  { %p420_p0 = scmp.ne.s32.totalorder %s20_s25, %s419_s26  ;;  %p425_p2 = scmp.lt.s32.totalorder %s419_s26, %s419_s26 }
   0x6   :  { %p426_p3 = por %p425_p2, %p424_p1 }
   0x8   :  { %p427_p4 = pnand %p426_p3, %p420_p0 }
   0xa   :  { %430 = shalt.err (!%p427_p4)
}
   0xb   :  { %s456_s27 = smov 128   ;;  %s457_s28 = smov 8  }
   0xc   :  { %25 = dma.hbm_to_vmem [thread:$0]  %s548_s0, 256, %s20_s25, [#allocation3], %s456_s27, %s456_s27, %s457_s28  }
   0xd   :  { %s458_s8 = smov [#allocation4]  }
   0xe   :  { %s31_s9 = sshll.u32 %s458_s8, 4  ;;  %s32_s9 = int_to_ptr.vmem [resolvable:$true] %s31_s9 }
   0xf   :  { %s439_s10 = scalar_lea.vmem %s32_s9, 256  ;;  %p444_p6 = scmp.lt.s32.totalorder %s32_s9, %s32_s9 }
  0x10   :  { %p440_p5 = scmp.ne.s32.totalorder %s32_s9, %s439_s10  ;;  %p445_p7 = scmp.lt.s32.totalorder %s439_s10, %s439_s10 }
  0x12   :  { %p446_p8 = por %p445_p7, %p444_p6 }
  0x14   :  { %p447_p9 = pnand %p446_p8, %p440_p5 }
  0x16   :  { %450 = shalt.err (!%p447_p9)
}
  0x17   :  { %37 = dma.hbm_to_vmem [thread:$0]  %s549_s1, 256, %s32_s9, [#allocation5], %s456_s27, %s456_s27, %s457_s28  }
  0x18   :  { %451 = dma.done.wait [#allocation3], 256  }
  0x19   :  { %452 = vsyncadd [#allocation3], 4294967040 }
  0x1a   :  { %453 = dma.done.wait [#allocation5], 256  }
  0x1b   :  { %454 = vsyncadd [#allocation5], 4294967040  ;;  %vm65_vm0 = vcmask 130048   ;;  %v57_v0 = vld [vmem:[#allocation4 + $0x8] sm:$0xff]  ;;  %v56_v1 = vld [vmem:[#allocation4] sm:$0xff]  ;;  %vm160_vm1 = vcmask 261120  }
  0x1c   :  { %v54_v2 = vld [vmem:[#allocation2] sm:$0xff]  ;;  %370 = vmatprep.subr.mxu0 %v57_v0  ;;  %v55_v3 = vld [vmem:[#allocation2 + $0x8] sm:$0xff]  ;;  %v152_v4 = vld [vmem:[%s551_s3 + $0x18] sm:$0xff]  ;;  %vm336_vm2 = vcmask 64512  }
  0x1d   :  { %374 = vmatprep.mubr.msk.f32.mxu0 %vm65_vm0, %v54_v2  ;;  %371 = vmatpush3.msra.mxu0 %v57_v0  ;;  %v151_v5 = vld [vmem:[%s551_s3 + $0x10] sm:$0xff]  ;;  %v150_v6 = vld [vmem:[%s551_s3 + $0x8] sm:$0xff]  ;;  %v149_v7 = vld [vmem:[%s551_s3] sm:$0xff] }
  0x1e   :  { %372 = vmatprep.subr.mxu0 %v56_v1  ;;  %377 = vmatprep.subr.mxu1 %v152_v4  ;;  %v345_v8 = vld [vmem:[%s550_s2] ss:$0 sm:$0xff]  ;;  %v247_v15 = vld [vmem:[%s553_s5 + $0x18] sm:$0xff]  ;;  %v246_v16 = vld [vmem:[%s553_s5 + $0x10] sm:$0xff] }
  0x1f   :  { %373 = vmatpush3.msra.mxu0 %v56_v1  ;;  %378 = vmatpush3.msra.mxu1 %v152_v4  ;;  %v245_v17 = vld [vmem:[%s553_s5 + $0x8] sm:$0xff]  ;;  %v244_v18 = vld [vmem:[%s553_s5] sm:$0xff] }
  0x20   :  { %375 = vmatmul.mubr.msk.f32.vlgmr.msra.gmra.mxu0 %vm65_vm0, %v55_v3  ;;  %379 = vmatprep.subr.mxu1 %v151_v5  ;;  %v348_v19 = vld [vmem:[%s552_s4] ss:$0 sm:$0xff] }
  0x21   :  { %380 = vmatpush3.msra.mxu1 %v151_v5  ;;  %388 = vmatprep.subr.mxu0 %v247_v15  ;;  %v351_v26 = vld [vmem:[%s554_s6] ss:$0 sm:$0xff] }
  0x22   :  { %381 = vmatprep.subr.mxu1 %v150_v6  ;;  %389 = vmatpush3.msra.mxu0 %v247_v15 }
  0x23   :  { %382 = vmatpush3.msra.mxu1 %v150_v6  ;;  %390 = vmatprep.subr.mxu0 %v246_v16 }
  0x24   :  { %383 = vmatprep.subr.mxu1 %v149_v7  ;;  %391 = vmatpush3.msra.mxu0 %v246_v16 }
  0x25   :  { %384 = vmatpush3.msra.mxu1 %v149_v7  ;;  %392 = vmatprep.subr.mxu0 %v245_v17 }
  0x26   :  { %393 = vmatpush3.msra.mxu0 %v245_v17 }
  0x27   :  { %394 = vmatprep.subr.mxu0 %v244_v18 }
  0x28   :  { %395 = vmatpush3.msra.mxu0 %v244_v18 }
  0xe0   :  { %v376_v9 = vpop.f32.mrf.mxu0 }
  0xe1   :  { %v144_v10 = vadd.f32 %v376_v9, %v345_v8 }
  0xe2   :  { %v138_v11 = vpop.f32.mrf.mxu0 }
  0xe3   :  { %v139_v12 = vadd.f32 %v345_v8, %v138_v11 }
  0xe5   :  { %403 = vtanh.f32 %v139_v12 }
  0xe6   :  { %405 = vtanh.f32 %v144_v10 }
  0xf2   :  { %v404_v13 = vpop.eup %403 }
  0xf3   :  { %v406_v14 = vpop.eup %405  ;;  %385 = vmatprep.mubr.msk.f32.mxu1 %vm160_vm1, %v404_v13 }
  0xf4   :  { %386 = vmatmul.mubr.msk.f32.vlgmr.msra.gmra.mxu1 %vm160_vm1, %v406_v14 }
 0x1b4   :  { %v387_v20 = vpop.f32.mrf.mxu1 }
 0x1b5   :  { %v239_v21 = vadd.f32 %v387_v20, %v348_v19 }
 0x1b6   :  { %v233_v22 = vpop.f32.mrf.mxu1 }
 0x1b7   :  { %v234_v23 = vadd.f32 %v348_v19, %v233_v22 }
 0x1b9   :  { %407 = vtanh.f32 %v234_v23 }
 0x1ba   :  { %409 = vtanh.f32 %v239_v21 }
 0x1c6   :  { %v408_v24 = vpop.eup %407 }
 0x1c7   :  { %v410_v25 = vpop.eup %409  ;;  %396 = vmatprep.mubr.msk.f32.mxu0 %vm160_vm1, %v408_v24 }
 0x1c8   :  { %397 = vmatmul.mubr.msk.f32.vlgmr.msra.gmra.mxu0 %vm160_vm1, %v410_v25 }
 0x288   :  { %v398_v27 = vpop.f32.mrf.mxu0 }
 0x289   :  { %v333_v28 = vadd.f32 %v398_v27, %v351_v26 }
 0x28a   :  { %v327_v29 = vpop.f32.mrf.mxu0 }
 0x28b   :  { %338 = vst.msk [vmem:[%s555_s7 + $0x8] sm:$0xff] %vm336_vm2, %v333_v28  ;;  %v328_v30 = vadd.f32 %v351_v26, %v327_v29 }
 0x28d   :  { %337 = vst.msk [vmem:[%s555_s7] sm:$0xff] %vm336_vm2, %v328_v30 }
 0x28e   :  { %343 = vsyncpa [#allocation3], 1 }
 0x28f   :  { %344 = vsyncpa [#allocation5], 1 }

</bundles_post_ra>
